<compile_context>
chip_gen: v6e
topology: v6e:2x2x1
jax: 0.10.0
libtpu: 0.0.40
codegen_flags: <defaults>
</compile_context>

<pallas_src>
import math

import jax
import jax.numpy as jnp
from jax import lax
from jax.experimental import pallas as pl
from jax.experimental.pallas import tpu as pltpu


def _make_attention_kernel(tq, s_actual, s_pad):
    """Builds the kernel for a given (static) query tile / sequence padding."""
    need_mask = s_pad != s_actual

    def kernel(x_ref, wq_ref, bq_ref, wk_ref, bk_ref, wv_ref, bv_ref,
               o_ref, k_ref, v_ref):
        # x_ref : (S_pad, D)   full (padded) sequence for this batch element
        # wq_ref: (D, D)       Q projection, 1/sqrt(D) pre-folded
        # bq_ref: (1, D) f32   (scaled)
        # wk/wv : (D, D)       K / V projections
        # bk/bv : (1, D) f32
        # o_ref : (TQ, D)      output tile
        # k_ref, v_ref: (S_pad, D) persistent VMEM scratch (compute dtype)
        mxu_dtype = x_ref.dtype
        qi = pl.program_id(1)

        # --- K/V projection: once per batch element (qi == 0), reused by all
        # query tiles via persistent VMEM scratch. ---------------------------
        @pl.when(qi == 0)
        def _():
            x_all = x_ref[...]
            k = jnp.dot(x_all, wk_ref[...],
                        preferred_element_type=jnp.float32) + bk_ref[...]
            v = jnp.dot(x_all, wv_ref[...],
                        preferred_element_type=jnp.float32) + bv_ref[...]
            k_ref[...] = k.astype(k_ref.dtype)
            v_ref[...] = v.astype(v_ref.dtype)

        # --- Q projection for this query tile only (scale already in Wq). ---
        q_start = pl.multiple_of(qi * tq, tq)
        xq = x_ref[pl.ds(q_start, tq), :]
        q = jnp.dot(xq, wq_ref[...],
                    preferred_element_type=jnp.float32) + bq_ref[...]

        # --- Scores (TQ, S_pad): NT matmul contracting the feature dims, so no
        # transposed copy of K goes through the XLU. --------------------------
        scores = lax.dot_general(
            q.astype(mxu_dtype), k_ref[...],
            dimension_numbers=(((1,), (1,)), ((), ())),
            preferred_element_type=jnp.float32)

        if need_mask:  # static branch: only when S was padded
            key_idx = lax.broadcasted_iota(jnp.int32, scores.shape, 1)
            scores = jnp.where(key_idx < s_actual, scores, jnp.float32(-1e30))

        # --- Numerically stable softmax in f32.  Normalization is deferred to
        # after the PV matmul (TQ*D multiplies instead of TQ*S). --------------
        m = jnp.max(scores, axis=-1, keepdims=True)
        e = jnp.exp(scores - m)
        denom = jnp.sum(e, axis=-1, keepdims=True)

        out = jnp.dot(e.astype(mxu_dtype), v_ref[...],
                      preferred_element_type=jnp.float32)
        out = out * pl.reciprocal(denom, approx=True)
        o_ref[...] = out.astype(o_ref.dtype)

    return kernel


def _vmem_capacity_bytes():
    try:
        return int(pltpu.get_tpu_info().vmem_capacity_bytes)
    except Exception:
        return 64 * 2**20  # conservative: v7x per-TensorCore VMEM


def softmax_self_attention(x, wq, wk, wv, bq, bk, bv, *,
                           q_tile=128, compute_dtype=None):
    """x: [B, S, D]; wq/wk/wv: [D, D]; bq/bk/bv: [1, D].  Returns [B, S, D].

    q_tile: query rows per grid step (128 is a good default on v5e/v7x; 256
    works well on v6e's 128 MiB VMEM).  compute_dtype: MXU operand dtype
    (bf16 or f32); accumulation and softmax math are always f32.
    """
    B, S, D = x.shape
    out_dtype = x.dtype
    if compute_dtype is None:
        compute_dtype = x.dtype

    # ---- Query tiling + ragged-S handling (pad, never fall back to (S,S)). --
    tq = min(q_tile, S)
    if tq < S and tq % 8 != 0:
        tq = max(8, (tq // 8) * 8)          # keep sublane-aligned query tiles
    n_q = -(-S // tq)
    s_pad = n_q * tq

    # ---- Fold the 1/sqrt(D) attention scale into the Q projection (free). ---
    scale = 1.0 / math.sqrt(D)
    wq_s = (wq.astype(jnp.float32) * scale).astype(compute_dtype)
    bq_s = bq.astype(jnp.float32) * scale   # biases stay f32 (post-accum add)
    wk_c = wk.astype(compute_dtype)
    wv_c = wv.astype(compute_dtype)
    bk_f = bk.astype(jnp.float32)
    bv_f = bv.astype(jnp.float32)

    x_c = x.astype(compute_dtype)
    if s_pad != S:
        x_c = jnp.pad(x_c, ((0, 0), (0, s_pad - S), (0, 0)))

    # ---- VMEM budget: real buffer list (+headroom), capped per generation. --
    itemsize = jnp.dtype(compute_dtype).itemsize
    out_itemsize = jnp.dtype(out_dtype).itemsize
    need = (
        2 * s_pad * D * itemsize                    # x block (double-buffered)
        + 2 * tq * D * out_itemsize * 2             # out block (double-buffered)
        + 3 * D * D * itemsize + 3 * D * 4          # weights + f32 biases
        + 2 * s_pad * D * itemsize                  # K/V scratch
        + 4 * (2 * tq * s_pad + 3 * tq * D + 2 * s_pad * D)  # f32 intermediates
    )
    cap = _vmem_capacity_bytes()
    vmem_limit = int(min(int(0.9 * cap), 100 * 2**20,
                         max(32 * 2**20, 2 * need)))

    kernel = _make_attention_kernel(tq, S, s_pad)

    def run(single_buffer_weights):
        if single_buffer_weights:
            def wspec(shape, index_map):
                # Grid-invariant blocks: single buffer -> half the VMEM.
                return pl.BlockSpec(shape, index_map,
                                    pipeline_mode=pl.Buffered(1))
        else:
            def wspec(shape, index_map):
                return pl.BlockSpec(shape, index_map)

        grid_spec = pltpu.PrefetchScalarGridSpec(
            num_scalar_prefetch=0,
            grid=(B, n_q),
            in_specs=[
                # x: one (S_pad, D) block per batch element, reused across qi
                # (kept double-buffered so the next batch's x prefetch overlaps).
                pl.BlockSpec((None, s_pad, D), lambda b, qi: (b, 0, 0)),
                wspec((D, D), lambda b, qi: (0, 0)),   # Wq (scaled)
                wspec((1, D), lambda b, qi: (0, 0)),   # bq (scaled, f32)
                wspec((D, D), lambda b, qi: (0, 0)),   # Wk
                wspec((1, D), lambda b, qi: (0, 0)),   # bk (f32)
                wspec((D, D), lambda b, qi: (0, 0)),   # Wv
                wspec((1, D), lambda b, qi: (0, 0)),   # bv (f32)
            ],
            out_specs=pl.BlockSpec((None, tq, D), lambda b, qi: (b, qi, 0)),
            scratch_shapes=[
                pltpu.VMEM((s_pad, D), compute_dtype),  # K (once per batch)
                pltpu.VMEM((s_pad, D), compute_dtype),  # V (once per batch)
            ],
        )
        return pl.pallas_call(
            kernel,
            out_shape=jax.ShapeDtypeStruct((B, s_pad, D), out_dtype),
            grid_spec=grid_spec,
            compiler_params=pltpu.CompilerParams(
                dimension_semantics=("parallel", "arbitrary"),
                vmem_limit_bytes=vmem_limit),
        )(x_c, wq_s, bq_s, wk_c, bk_f, wv_c, bv_f)

    single = hasattr(pl, "Buffered")
    try:
        out = run(single)
    except Exception:
        if not single:
            raise
        # Older JAX/Mosaic builds may reject pipeline_mode=Buffered(1);
        # fall back to default double buffering.
        out = run(False)

    if s_pad != S:
        out = out[:, :S, :]
    return out


def _reference(x, wq, wk, wv, bq, bk, bv):
    d = x.shape[-1]
    q = x @ wq + bq
    k = x @ wk + bk
    v = x @ wv + bv
    scores = jnp.einsum("bsd,btd->bst", q, k) / math.sqrt(d)
    w = jax.nn.softmax(scores, axis=-1)
    return jnp.einsum("bst,btd->bsd", w, v)


if __name__ == "__main__":
    B, S, D = 2, 8, 32  # batch, seq, d_model

    key = jax.random.PRNGKey(0)
    kx, kwq, kwk, kwv, kbq, kbk, kbv, kx2 = jax.random.split(key, 8)

    # Deterministic init mirroring nn.Linear's uniform(-1/sqrt(D), 1/sqrt(D)).
    bound = 1.0 / math.sqrt(D)
    x = jax.random.normal(kx, (B, S, D), dtype=jnp.float32)
    wq = jax.random.uniform(kwq, (D, D), jnp.float32, -bound, bound)
    wk = jax.random.uniform(kwk, (D, D), jnp.float32, -bound, bound)
    wv = jax.random.uniform(kwv, (D, D), jnp.float32, -bound, bound)
    bq = jax.random.uniform(kbq, (1, D), jnp.float32, -bound, bound)
    bk = jax.random.uniform(kbk, (1, D), jnp.float32, -bound, bound)
    bv = jax.random.uniform(kbv, (1, D), jnp.float32, -bound, bound)

    ref = _reference(x, wq, wk, wv, bq, bk, bv)

    # f32 MXU path: only the approx reciprocal deviates from the reference.
    out_f32 = jax.block_until_ready(
        softmax_self_attention(x, wq, wk, wv, bq, bk, bv,
                               compute_dtype=jnp.float32))
    assert out_f32.shape == (B, S, D)
    assert jnp.allclose(out_f32, ref, atol=5e-3, rtol=5e-3), "f32 path mismatch"

    # bf16 MXU inputs with f32 accumulation / f32 softmax: looser tolerance.
    out_bf16 = jax.block_until_ready(
        softmax_self_attention(x, wq, wk, wv, bq, bk, bv,
                               compute_dtype=jnp.bfloat16))
    assert out_bf16.shape == (B, S, D)
    assert jnp.allclose(out_bf16, ref, atol=5e-2, rtol=5e-2), "bf16 path mismatch"

    # Ragged S: exercises padding + in-kernel key masking and multiple query
    # tiles per batch element (tq=8, S=12 -> S_pad=16, 2 tiles).
    S2 = 12
    x2 = jax.random.normal(kx2, (B, S2, D), dtype=jnp.float32)
    ref2 = _reference(x2, wq, wk, wv, bq, bk, bv)
    out_ragged = jax.block_until_ready(
        softmax_self_attention(x2, wq, wk, wv, bq, bk, bv,
                               q_tile=8, compute_dtype=jnp.float32))
    assert out_ragged.shape == (B, S2, D)
    assert jnp.allclose(out_ragged, ref2, atol=5e-3, rtol=5e-3), "ragged path mismatch"

    print("KERNEL_OK")
</pallas_src>

<mosaic_0001>
module attributes {stable_mosaic.version = 11 : i64} {
  func.func @kernel(%arg0: i32, %arg1: i32, %arg2: memref<1x8x32xf32, #tpu.memory_space<vmem>>, %arg3: memref<32x32xf32, #tpu.memory_space<vmem>>, %arg4: memref<1x32xf32, #tpu.memory_space<vmem>>, %arg5: memref<32x32xf32, #tpu.memory_space<vmem>>, %arg6: memref<1x32xf32, #tpu.memory_space<vmem>>, %arg7: memref<32x32xf32, #tpu.memory_space<vmem>>, %arg8: memref<1x32xf32, #tpu.memory_space<vmem>>, %arg9: memref<1x8x32xf32, #tpu.memory_space<vmem>>, %arg10: memref<8x32xf32, #tpu.memory_space<vmem>>, %arg11: memref<8x32xf32, #tpu.memory_space<vmem>>) attributes {dimension_semantics = [#tpu.dimension_semantics<parallel>, #tpu.dimension_semantics<arbitrary>], iteration_bounds = array<i64: 2, 1>, scalar_prefetch = 0 : i64, scratch_operands = 2 : i64, tpu.core_type = #tpu.core_type<tc>, window_params = [{transform_indices = @transform_0, window_bounds = array<i64: 1, 8, 32>}, {pipeline_mode = #tpu.pipeline_mode<synchronous>, transform_indices = @transform_1, window_bounds = array<i64: 32, 32>}, {pipeline_mode = #tpu.pipeline_mode<synchronous>, transform_indices = @transform_2, window_bounds = array<i64: 1, 32>}, {pipeline_mode = #tpu.pipeline_mode<synchronous>, transform_indices = @transform_3, window_bounds = array<i64: 32, 32>}, {pipeline_mode = #tpu.pipeline_mode<synchronous>, transform_indices = @transform_4, window_bounds = array<i64: 1, 32>}, {pipeline_mode = #tpu.pipeline_mode<synchronous>, transform_indices = @transform_5, window_bounds = array<i64: 32, 32>}, {pipeline_mode = #tpu.pipeline_mode<synchronous>, transform_indices = @transform_6, window_bounds = array<i64: 1, 32>}, {transform_indices = @transform_7, window_bounds = array<i64: 1, 8, 32>}]} {
    %c0_i32 = arith.constant 0 : i32
    %0 = arith.cmpi eq, %arg1, %c0_i32 : i32
    %1 = arith.extui %0 : i1 to i32
    %c0_i32_0 = arith.constant 0 : i32
    %2 = arith.cmpi ne, %1, %c0_i32_0 : i32
    scf.if %2 {
      %c0_17 = arith.constant 0 : index
      %c0_18 = arith.constant 0 : index
      %c0_19 = arith.constant 0 : index
      %30 = vector.load %arg2[%c0_17, %c0_18, %c0_19] : memref<1x8x32xf32, #tpu.memory_space<vmem>>, vector<1x8x32xf32>
      %31 = vector.shape_cast %30 : vector<1x8x32xf32> to vector<8x32xf32>
      %c0_20 = arith.constant 0 : index
      %c0_21 = arith.constant 0 : index
      %32 = vector.load %arg5[%c0_20, %c0_21] : memref<32x32xf32, #tpu.memory_space<vmem>>, vector<32x32xf32>
      %cst_22 = arith.constant dense<0.000000e+00> : vector<8x32xf32>
      %33 = tpu.matmul %31, %32, %cst_22 {dimension_numbers = #tpu.dot_dimension_numbers<[1], [0], [0], [1], [0, 0, 1, 1], [], []>} : vector<8x32xf32>, vector<32x32xf32>, vector<8x32xf32> -> vector<8x32xf32>
      %c0_23 = arith.constant 0 : index
      %c0_24 = arith.constant 0 : index
      %34 = vector.load %arg6[%c0_23, %c0_24] : memref<1x32xf32, #tpu.memory_space<vmem>>, vector<1x32xf32>
      %35 = vector.broadcast %34 : vector<1x32xf32> to vector<8x32xf32>
      %36 = arith.addf %33, %35 : vector<8x32xf32>
      %c0_25 = arith.constant 0 : index
      %c0_26 = arith.constant 0 : index
      %37 = vector.load %arg7[%c0_25, %c0_26] : memref<32x32xf32, #tpu.memory_space<vmem>>, vector<32x32xf32>
      %cst_27 = arith.constant dense<0.000000e+00> : vector<8x32xf32>
      %38 = tpu.matmul %31, %37, %cst_27 {dimension_numbers = #tpu.dot_dimension_numbers<[1], [0], [0], [1], [0, 0, 1, 1], [], []>} : vector<8x32xf32>, vector<32x32xf32>, vector<8x32xf32> -> vector<8x32xf32>
      %c0_28 = arith.constant 0 : index
      %c0_29 = arith.constant 0 : index
      %39 = vector.load %arg8[%c0_28, %c0_29] : memref<1x32xf32, #tpu.memory_space<vmem>>, vector<1x32xf32>
      %40 = vector.broadcast %39 : vector<1x32xf32> to vector<8x32xf32>
      %41 = arith.addf %38, %40 : vector<8x32xf32>
      %c0_30 = arith.constant 0 : index
      %c0_31 = arith.constant 0 : index
      %42 = vector.load %arg10[%c0_30, %c0_31] : memref<8x32xf32, #tpu.memory_space<vmem>>, vector<8x32xf32>
      tpu.vector_store %arg10[%c0_30, %c0_31], %36 {strides = array<i32>} : memref<8x32xf32, #tpu.memory_space<vmem>>, vector<8x32xf32>,
      %c0_32 = arith.constant 0 : index
      %c0_33 = arith.constant 0 : index
      %43 = vector.load %arg11[%c0_32, %c0_33] : memref<8x32xf32, #tpu.memory_space<vmem>>, vector<8x32xf32>
      tpu.vector_store %arg11[%c0_32, %c0_33], %41 {strides = array<i32>} : memref<8x32xf32, #tpu.memory_space<vmem>>, vector<8x32xf32>,
    } else {
    }
    %c8_i32 = arith.constant 8 : i32
    %3 = arith.muli %arg1, %c8_i32 : i32
    %4 = tpu.assume_multiple %3, 8 : i32
    %c0 = arith.constant 0 : index
    %5 = arith.index_cast %4 : i32 to index
    %c0_1 = arith.constant 0 : index
    %6 = vector.load %arg2[%c0, %5, %c0_1] : memref<1x8x32xf32, #tpu.memory_space<vmem>>, vector<1x8x32xf32>
    %7 = vector.shape_cast %6 : vector<1x8x32xf32> to vector<8x32xf32>
    %c0_2 = arith.constant 0 : index
    %c0_3 = arith.constant 0 : index
    %8 = vector.load %arg3[%c0_2, %c0_3] : memref<32x32xf32, #tpu.memory_space<vmem>>, vector<32x32xf32>
    %cst = arith.constant dense<0.000000e+00> : vector<8x32xf32>
    %9 = tpu.matmul %7, %8, %cst {dimension_numbers = #tpu.dot_dimension_numbers<[1], [0], [0], [1], [0, 0, 1, 1], [], []>} : vector<8x32xf32>, vector<32x32xf32>, vector<8x32xf32> -> vector<8x32xf32>
    %c0_4 = arith.constant 0 : index
    %c0_5 = arith.constant 0 : index
    %10 = vector.load %arg4[%c0_4, %c0_5] : memref<1x32xf32, #tpu.memory_space<vmem>>, vector<1x32xf32>
    %11 = vector.broadcast %10 : vector<1x32xf32> to vector<8x32xf32>
    %12 = arith.addf %9, %11 : vector<8x32xf32>
    %c0_6 = arith.constant 0 : index
    %c0_7 = arith.constant 0 : index
    %13 = vector.load %arg10[%c0_6, %c0_7] : memref<8x32xf32, #tpu.memory_space<vmem>>, vector<8x32xf32>
    %cst_8 = arith.constant dense<0.000000e+00> : vector<8x8xf32>
    %14 = tpu.matmul %12, %13, %cst_8 {dimension_numbers = #tpu.dot_dimension_numbers<[1], [1], [0], [0], [0, 0, 1, 0], [], []>} : vector<8x32xf32>, vector<8x32xf32>, vector<8x8xf32> -> vector<8x8xf32>
    %cst_9 = arith.constant dense<0xFF800000> : vector<8xf32>
    %15 = vector.multi_reduction <maximumf>, %14, %cst_9 [1] : vector<8x8xf32> to vector<8xf32>
    %16 = vector.shape_cast %15 : vector<8xf32> to vector<8x1xf32>
    %17 = vector.broadcast %16 : vector<8x1xf32> to vector<8x8xf32>
    %18 = arith.subf %14, %17 : vector<8x8xf32>
    %19 = math.exp %18 : vector<8x8xf32>
    %cst_10 = arith.constant dense<0.000000e+00> : vector<8xf32>
    %20 = vector.multi_reduction <add>, %19, %cst_10 [1] : vector<8x8xf32> to vector<8xf32>
    %21 = vector.shape_cast %20 : vector<8xf32> to vector<8x1xf32>
    %c0_11 = arith.constant 0 : index
    %c0_12 = arith.constant 0 : index
    %22 = vector.load %arg11[%c0_11, %c0_12] : memref<8x32xf32, #tpu.memory_space<vmem>>, vector<8x32xf32>
    %cst_13 = arith.constant dense<0.000000e+00> : vector<8x32xf32>
    %23 = tpu.matmul %19, %22, %cst_13 {dimension_numbers = #tpu.dot_dimension_numbers<[1], [0], [0], [1], [0, 0, 1, 1], [], []>} : vector<8x8xf32>, vector<8x32xf32>, vector<8x32xf32> -> vector<8x32xf32>
    %24 = tpu.reciprocal %21 {approx = true} : vector<8x1xf32> -> vector<8x1xf32>
    %25 = vector.broadcast %24 : vector<8x1xf32> to vector<8x32xf32>
    %26 = arith.mulf %23, %25 : vector<8x32xf32>
    %c0_14 = arith.constant 0 : index
    %c0_15 = arith.constant 0 : index
    %c0_16 = arith.constant 0 : index
    %27 = vector.load %arg9[%c0_14, %c0_15, %c0_16] : memref<1x8x32xf32, #tpu.memory_space<vmem>>, vector<1x8x32xf32>
    %28 = vector.shape_cast %27 : vector<1x8x32xf32> to vector<8x32xf32>
    %29 = vector.shape_cast %26 : vector<8x32xf32> to vector<1x8x32xf32>
    tpu.vector_store %arg9[%c0_14, %c0_15, %c0_16], %29 {strides = array<i32>} : memref<1x8x32xf32, #tpu.memory_space<vmem>>, vector<1x8x32xf32>,
    return
  }
  func.func @transform_0(%arg0: i32, %arg1: i32) -> (i32, i32, i32) {
    %c0_i32 = arith.constant 0 : i32
    %c0_i32_0 = arith.constant 0 : i32
    %c0_i32_1 = arith.constant 0 : i32
    return %arg0, %c0_i32, %c0_i32_0 : i32, i32, i32
  }
  func.func @transform_1(%arg0: i32, %arg1: i32) -> (i32, i32) {
    %c0_i32 = arith.constant 0 : i32
    %c0_i32_0 = arith.constant 0 : i32
    %c0_i32_1 = arith.constant 0 : i32
    return %c0_i32, %c0_i32_0 : i32, i32
  }
  func.func @transform_2(%arg0: i32, %arg1: i32) -> (i32, i32) {
    %c0_i32 = arith.constant 0 : i32
    %c0_i32_0 = arith.constant 0 : i32
    %c0_i32_1 = arith.constant 0 : i32
    return %c0_i32, %c0_i32_0 : i32, i32
  }
  func.func @transform_3(%arg0: i32, %arg1: i32) -> (i32, i32) {
    %c0_i32 = arith.constant 0 : i32
    %c0_i32_0 = arith.constant 0 : i32
    %c0_i32_1 = arith.constant 0 : i32
    return %c0_i32, %c0_i32_0 : i32, i32
  }
  func.func @transform_4(%arg0: i32, %arg1: i32) -> (i32, i32) {
    %c0_i32 = arith.constant 0 : i32
    %c0_i32_0 = arith.constant 0 : i32
    %c0_i32_1 = arith.constant 0 : i32
    return %c0_i32, %c0_i32_0 : i32, i32
  }
  func.func @transform_5(%arg0: i32, %arg1: i32) -> (i32, i32) {
    %c0_i32 = arith.constant 0 : i32
    %c0_i32_0 = arith.constant 0 : i32
    %c0_i32_1 = arith.constant 0 : i32
    return %c0_i32, %c0_i32_0 : i32, i32
  }
  func.func @transform_6(%arg0: i32, %arg1: i32) -> (i32, i32) {
    %c0_i32 = arith.constant 0 : i32
    %c0_i32_0 = arith.constant 0 : i32
    %c0_i32_1 = arith.constant 0 : i32
    return %c0_i32, %c0_i32_0 : i32, i32
  }
  func.func @transform_7(%arg0: i32, %arg1: i32) -> (i32, i32, i32) {
    %c0_i32 = arith.constant 0 : i32
    %c0_i32_0 = arith.constant 0 : i32
    return %arg0, %arg1, %c0_i32 : i32, i32, i32
  }
}

module attributes {stable_mosaic.version = 11 : i64} {
  func.func @kernel(%arg0: i32, %arg1: i32, %arg2: memref<1x8x32xf32, #tpu.memory_space<vmem>>, %arg3: memref<32x32xf32, #tpu.memory_space<vmem>>, %arg4: memref<1x32xf32, #tpu.memory_space<vmem>>, %arg5: memref<32x32xf32, #tpu.memory_space<vmem>>, %arg6: memref<1x32xf32, #tpu.memory_space<vmem>>, %arg7: memref<32x32xf32, #tpu.memory_space<vmem>>, %arg8: memref<1x32xf32, #tpu.memory_space<vmem>>, %arg9: memref<1x8x32xf32, #tpu.memory_space<vmem>>, %arg10: memref<8x32xf32, #tpu.memory_space<vmem>>, %arg11: memref<8x32xf32, #tpu.memory_space<vmem>>) attributes {dimension_semantics = [#tpu.dimension_semantics<parallel>, #tpu.dimension_semantics<arbitrary>], iteration_bounds = array<i64: 2, 1>, scalar_prefetch = 0 : i64, scratch_operands = 2 : i64, tpu.core_type = #tpu.core_type<tc>, window_params = [{transform_indices = @transform_0, window_bounds = array<i64: 1, 8, 32>}, {pipeline_mode = #tpu.pipeline_mode<synchronous>, transform_indices = @transform_1, window_bounds = array<i64: 32, 32>}, {pipeline_mode = #tpu.pipeline_mode<synchronous>, transform_indices = @transform_2, window_bounds = array<i64: 1, 32>}, {pipeline_mode = #tpu.pipeline_mode<synchronous>, transform_indices = @transform_3, window_bounds = array<i64: 32, 32>}, {pipeline_mode = #tpu.pipeline_mode<synchronous>, transform_indices = @transform_4, window_bounds = array<i64: 1, 32>}, {pipeline_mode = #tpu.pipeline_mode<synchronous>, transform_indices = @transform_5, window_bounds = array<i64: 32, 32>}, {pipeline_mode = #tpu.pipeline_mode<synchronous>, transform_indices = @transform_6, window_bounds = array<i64: 1, 32>}, {transform_indices = @transform_7, window_bounds = array<i64: 1, 8, 32>}]} {
    %c0_i32 = arith.constant 0 : i32
    %0 = arith.cmpi eq, %arg1, %c0_i32 : i32
    %1 = arith.extui %0 : i1 to i32
    %c0_i32_0 = arith.constant 0 : i32
    %2 = arith.cmpi ne, %1, %c0_i32_0 : i32
    scf.if %2 {
      %c0_17 = arith.constant 0 : index
      %c0_18 = arith.constant 0 : index
      %c0_19 = arith.constant 0 : index
      %30 = vector.load %arg2[%c0_17, %c0_18, %c0_19] : memref<1x8x32xf32, #tpu.memory_space<vmem>>, vector<1x8x32xf32>
      %31 = vector.shape_cast %30 : vector<1x8x32xf32> to vector<8x32xf32>
      %c0_20 = arith.constant 0 : index
      %c0_21 = arith.constant 0 : index
      %32 = vector.load %arg5[%c0_20, %c0_21] : memref<32x32xf32, #tpu.memory_space<vmem>>, vector<32x32xf32>
      %cst_22 = arith.constant dense<0.000000e+00> : vector<8x32xf32>
      %33 = tpu.matmul %31, %32, %cst_22 {dimension_numbers = #tpu.dot_dimension_numbers<[1], [0], [0], [1], [0, 0, 1, 1], [], []>} : vector<8x32xf32>, vector<32x32xf32>, vector<8x32xf32> -> vector<8x32xf32>
      %c0_23 = arith.constant 0 : index
      %c0_24 = arith.constant 0 : index
      %34 = vector.load %arg6[%c0_23, %c0_24] : memref<1x32xf32, #tpu.memory_space<vmem>>, vector<1x32xf32>
      %35 = vector.broadcast %34 : vector<1x32xf32> to vector<8x32xf32>
      %36 = arith.addf %33, %35 : vector<8x32xf32>
      %c0_25 = arith.constant 0 : index
      %c0_26 = arith.constant 0 : index
      %37 = vector.load %arg7[%c0_25, %c0_26] : memref<32x32xf32, #tpu.memory_space<vmem>>, vector<32x32xf32>
      %cst_27 = arith.constant dense<0.000000e+00> : vector<8x32xf32>
      %38 = tpu.matmul %31, %37, %cst_27 {dimension_numbers = #tpu.dot_dimension_numbers<[1], [0], [0], [1], [0, 0, 1, 1], [], []>} : vector<8x32xf32>, vector<32x32xf32>, vector<8x32xf32> -> vector<8x32xf32>
      %c0_28 = arith.constant 0 : index
      %c0_29 = arith.constant 0 : index
      %39 = vector.load %arg8[%c0_28, %c0_29] : memref<1x32xf32, #tpu.memory_space<vmem>>, vector<1x32xf32>
      %40 = vector.broadcast %39 : vector<1x32xf32> to vector<8x32xf32>
      %41 = arith.addf %38, %40 : vector<8x32xf32>
      %c0_30 = arith.constant 0 : index
      %c0_31 = arith.constant 0 : index
      %42 = vector.load %arg10[%c0_30, %c0_31] : memref<8x32xf32, #tpu.memory_space<vmem>>, vector<8x32xf32>
      tpu.vector_store %arg10[%c0_30, %c0_31], %36 {strides = array<i32>} : memref<8x32xf32, #tpu.memory_space<vmem>>, vector<8x32xf32>,
      %c0_32 = arith.constant 0 : index
      %c0_33 = arith.constant 0 : index
      %43 = vector.load %arg11[%c0_32, %c0_33] : memref<8x32xf32, #tpu.memory_space<vmem>>, vector<8x32xf32>
      tpu.vector_store %arg11[%c0_32, %c0_33], %41 {strides = array<i32>} : memref<8x32xf32, #tpu.memory_space<vmem>>, vector<8x32xf32>,
    } else {
    }
    %c8_i32 = arith.constant 8 : i32
    %3 = arith.muli %arg1, %c8_i32 : i32
    %4 = tpu.assume_multiple %3, 8 : i32
    %c0 = arith.constant 0 : index
    %5 = arith.index_cast %4 : i32 to index
    %c0_1 = arith.constant 0 : index
    %6 = vector.load %arg2[%c0, %5, %c0_1] : memref<1x8x32xf32, #tpu.memory_space<vmem>>, vector<1x8x32xf32>
    %7 = vector.shape_cast %6 : vector<1x8x32xf32> to vector<8x32xf32>
    %c0_2 = arith.constant 0 : index
    %c0_3 = arith.constant 0 : index
    %8 = vector.load %arg3[%c0_2, %c0_3] : memref<32x32xf32, #tpu.memory_space<vmem>>, vector<32x32xf32>
    %cst = arith.constant dense<0.000000e+00> : vector<8x32xf32>
    %9 = tpu.matmul %7, %8, %cst {dimension_numbers = #tpu.dot_dimension_numbers<[1], [0], [0], [1], [0, 0, 1, 1], [], []>} : vector<8x32xf32>, vector<32x32xf32>, vector<8x32xf32> -> vector<8x32xf32>
    %c0_4 = arith.constant 0 : index
    %c0_5 = arith.constant 0 : index
    %10 = vector.load %arg4[%c0_4, %c0_5] : memref<1x32xf32, #tpu.memory_space<vmem>>, vector<1x32xf32>
    %11 = vector.broadcast %10 : vector<1x32xf32> to vector<8x32xf32>
    %12 = arith.addf %9, %11 : vector<8x32xf32>
    %c0_6 = arith.constant 0 : index
    %c0_7 = arith.constant 0 : index
    %13 = vector.load %arg10[%c0_6, %c0_7] : memref<8x32xf32, #tpu.memory_space<vmem>>, vector<8x32xf32>
    %cst_8 = arith.constant dense<0.000000e+00> : vector<8x8xf32>
    %14 = tpu.matmul %12, %13, %cst_8 {dimension_numbers = #tpu.dot_dimension_numbers<[1], [1], [0], [0], [0, 0, 1, 0], [], []>} : vector<8x32xf32>, vector<8x32xf32>, vector<8x8xf32> -> vector<8x8xf32>
    %cst_9 = arith.constant dense<0xFF800000> : vector<8xf32>
    %15 = vector.multi_reduction <maximumf>, %14, %cst_9 [1] : vector<8x8xf32> to vector<8xf32>
    %16 = vector.shape_cast %15 : vector<8xf32> to vector<8x1xf32>
    %17 = vector.broadcast %16 : vector<8x1xf32> to vector<8x8xf32>
    %18 = arith.subf %14, %17 : vector<8x8xf32>
    %19 = math.exp %18 : vector<8x8xf32>
    %cst_10 = arith.constant dense<0.000000e+00> : vector<8xf32>
    %20 = vector.multi_reduction <add>, %19, %cst_10 [1] : vector<8x8xf32> to vector<8xf32>
    %21 = vector.shape_cast %20 : vector<8xf32> to vector<8x1xf32>
    %c0_11 = arith.constant 0 : index
    %c0_12 = arith.constant 0 : index
    %22 = vector.load %arg11[%c0_11, %c0_12] : memref<8x32xf32, #tpu.memory_space<vmem>>, vector<8x32xf32>
    %cst_13 = arith.constant dense<0.000000e+00> : vector<8x32xf32>
    %23 = tpu.matmul %19, %22, %cst_13 {dimension_numbers = #tpu.dot_dimension_numbers<[1], [0], [0], [1], [0, 0, 1, 1], [], []>} : vector<8x8xf32>, vector<8x32xf32>, vector<8x32xf32> -> vector<8x32xf32>
    %24 = tpu.reciprocal %21 {approx = true} : vector<8x1xf32> -> vector<8x1xf32>
    %25 = vector.broadcast %24 : vector<8x1xf32> to vector<8x32xf32>
    %26 = arith.mulf %23, %25 : vector<8x32xf32>
    %c0_14 = arith.constant 0 : index
    %c0_15 = arith.constant 0 : index
    %c0_16 = arith.constant 0 : index
    %27 = vector.load %arg9[%c0_14, %c0_15, %c0_16] : memref<1x8x32xf32, #tpu.memory_space<vmem>>, vector<1x8x32xf32>
    %28 = vector.shape_cast %27 : vector<1x8x32xf32> to vector<8x32xf32>
    %29 = vector.shape_cast %26 : vector<8x32xf32> to vector<1x8x32xf32>
    tpu.vector_store %arg9[%c0_14, %c0_15, %c0_16], %29 {strides = array<i32>} : memref<1x8x32xf32, #tpu.memory_space<vmem>>, vector<1x8x32xf32>,
    return
  }
  func.func @transform_0(%arg0: i32, %arg1: i32) -> (i32, i32, i32) {
    %c0_i32 = arith.constant 0 : i32
    %c0_i32_0 = arith.constant 0 : i32
    %c0_i32_1 = arith.constant 0 : i32
    return %arg0, %c0_i32, %c0_i32_0 : i32, i32, i32
  }
  func.func @transform_1(%arg0: i32, %arg1: i32) -> (i32, i32) {
    %c0_i32 = arith.constant 0 : i32
    %c0_i32_0 = arith.constant 0 : i32
    %c0_i32_1 = arith.constant 0 : i32
    return %c0_i32, %c0_i32_0 : i32, i32
  }
  func.func @transform_2(%arg0: i32, %arg1: i32) -> (i32, i32) {
    %c0_i32 = arith.constant 0 : i32
    %c0_i32_0 = arith.constant 0 : i32
    %c0_i32_1 = arith.constant 0 : i32
    return %c0_i32, %c0_i32_0 : i32, i32
  }
  func.func @transform_3(%arg0: i32, %arg1: i32) -> (i32, i32) {
    %c0_i32 = arith.constant 0 : i32
    %c0_i32_0 = arith.constant 0 : i32
    %c0_i32_1 = arith.constant 0 : i32
    return %c0_i32, %c0_i32_0 : i32, i32
  }
  func.func @transform_4(%arg0: i32, %arg1: i32) -> (i32, i32) {
    %c0_i32 = arith.constant 0 : i32
    %c0_i32_0 = arith.constant 0 : i32
    %c0_i32_1 = arith.constant 0 : i32
    return %c0_i32, %c0_i32_0 : i32, i32
  }
  func.func @transform_5(%arg0: i32, %arg1: i32) -> (i32, i32) {
    %c0_i32 = arith.constant 0 : i32
    %c0_i32_0 = arith.constant 0 : i32
    %c0_i32_1 = arith.constant 0 : i32
    return %c0_i32, %c0_i32_0 : i32, i32
  }
  func.func @transform_6(%arg0: i32, %arg1: i32) -> (i32, i32) {
    %c0_i32 = arith.constant 0 : i32
    %c0_i32_0 = arith.constant 0 : i32
    %c0_i32_1 = arith.constant 0 : i32
    return %c0_i32, %c0_i32_0 : i32, i32
  }
  func.func @transform_7(%arg0: i32, %arg1: i32) -> (i32, i32, i32) {
    %c0_i32 = arith.constant 0 : i32
    %c0_i32_0 = arith.constant 0 : i32
    return %arg0, %arg1, %c0_i32 : i32, i32, i32
  }
}

</mosaic_0001>

<bundles_post_ra>
// kernel: tpu_custom_call.1
= control target key start
LH: loop header
LB: loop body
LE: loop exit
PB: predicated region body
PF: predicated region fallthrough
CT: control target
= control target key end

     0   :  { %s1556_s0 = inlined_call_operand.hbm [shape: f32[2,8,32], index: 0, kind: input, shape index: {}]   ;;  %s1557_s1 = inlined_call_operand.hbm [shape: f32[32,32], index: 1, kind: input, shape index: {}]   ;;  %s1558_s2 = inlined_call_operand.vmem [shape: f32[1,32], index: 2, kind: input, shape index: {}]   ;;  %s1559_s3 = inlined_call_operand.hbm [shape: f32[32,32], index: 3, kind: input, shape index: {}]   ;;  %s1560_s4 = inlined_call_operand.vmem [shape: f32[1,32], index: 4, kind: input, shape index: {}]   ;;  %s1561_s5 = inlined_call_operand.hbm [shape: f32[32,32], index: 5, kind: input, shape index: {}]   ;;  %s1562_s6 = inlined_call_operand.vmem [shape: f32[1,32], index: 6, kind: input, shape index: {}]   ;;  %s1563_s7 = inlined_call_operand.hbm [shape: f32[2,8,32], index: 7, kind: output, shape index: {}]  }
   0x1   :  { %1568 = sst [smem:[#allocation17_spill]] %s1557_s1 }
   0x2   :  { %1569 = sst [smem:[#allocation18_spill]] %s1559_s3 }
   0x3   :  { %1570 = sst [smem:[#allocation19_spill]] %s1561_s5 }
   0x4   :  { %12 = vsyncpa [#allocation5], 0 }
   0x5   :  { %14 = vsyncpa [#allocation5 + $0x1], 0 }
   0x6   :  { %15 = vsyncpa [#allocation8], 0 }
   0x7   :  { %16 = vsyncpa [#allocation11], 0 }
   0x8   :  { %17 = vsyncpa [#allocation6], 0 }
   0x9   :  { %19 = vsyncpa [#allocation6 + $0x1], 0  ;;  %s1338_s24 = smov 0   ;;  %s1340_s25 = smov 0  }
   0xa   :  { %s1342_s26 = smov 0   ;;  %s1344_s27 = smov 0  }
   0xb   :  { %s1346_s28 = smov 0   ;;  %s1348_s29 = smov 0  }
   0xc LB: > { %s902_s30 = sadd.s32 4294967295, %s1287_s29   ;;  %s903_s8 = sadd.s32 4294967294, %s1287_s29   ;;  %s1287_s29 = sphi %s1348_s29, %s25_s29   ;;  %s1283_s28 = sphi %s1346_s28, %s1591_s28   ;;  %s1279_s27 = sphi %s1344_s27, %s1590_s27   ;;  %s1275_s26 = sphi %s1342_s26, %s1589_s26   ;;  %s1271_s25 = sphi %s1340_s25, %s1588_s25   ;;  %s1267_s24 = sphi %s1338_s24, %s1587_s24  }
   0xd   : > { %p57_p0 = scmp.ne.s32.totalorder %s1271_s25, %s1267_s24  ;;  %p1372_p1 = scmp.eq.s32.totalorder %s902_s30, 0 }
   0xe   : > { %p1376_p2 = scmp.eq.s32.totalorder %s902_s30, 1  ;;  %p215_p3 = scmp.eq.s32.totalorder %s903_s8, 1 }
   0xf   : > { %s1571_s9 = scalar_select %p1372_p1, 1, 0 }
  0x10   : > { %p1382_p4 = por %p1372_p1, %p57_p0  ;;  %p904_p5 = scmp.ge.s32.totalorder %s1287_s29, 1 }
  0x11   : > { %p1387_p6 = por %p215_p3, %p57_p0  ;;  %p222_p7 = scmp.lt.s32.totalorder %s1287_s29, 3 }
  0x12   : > { %s1573_s11 = scalar_select %p1382_p4, 1, 0 }
  0x13   : > { %s1574_s12 = scalar_select %p1387_p6, 1, 0 }
  0x14   : > { %p1392_p8 = pnand %p904_p5, %p222_p7  ;;  %s1289_s14 = smov [#allocation7]  }
  0x15   : > { %s234_s15 = sshll.u32 %s1289_s14, 4  ;;  %s1290_s17 = smov [#allocation9]   ;;  %s235_s15 = int_to_ptr.vmem [resolvable:$true] %s234_s15 }
  0x16   : > { %s1575_s13 = scalar_select %p1392_p8, 1, 0 }
  0x17   : > { %p1008_p9 = pneg %p1392_p8  ;;  %s250_s18 = sshll.u32 %s1290_s17, 4  ;;  %s251_s18 = int_to_ptr.vmem [resolvable:$true] %s250_s18 }
  0x18   : > { %s1291_s19 = smov [#allocation10]   ;;  %s1104_s21 = scalar_lea.vmem %s235_s15, 512 }
  0x19   : > { %p1401_p11 = pnand %p1008_p9, %p1372_p1  ;;  %s266_s20 = sshll.u32 %s1291_s19, 4  ;;  %s267_s20 = int_to_ptr.vmem [resolvable:$true] %s266_s20 }
  0x1a   : > { %p1105_p13 = scmp.ne.s32.totalorder %s235_s15, %s1104_s21  ;;  %p1112_p5 = scmp.lt.s32.totalorder %s235_s15, %s235_s15 }
  0x1b   : > { %p1095_p12 = pneg %p1401_p11  ;;  %p1113_p7 = scmp.lt.s32.totalorder %s1104_s21, %s1104_s21 }
  0x1d   : > { %p1107_p0 = pnand %p1105_p13, %p1095_p12  ;;  %p1114_p9 = por %p1113_p7, %p1112_p5 }
  0x1f   : > { %p1108_p3 = pneg %p1107_p0 }
  0x21   : > { %p1115_p10 = pnand %p1114_p9, %p1108_p3 }
  0x23   : > { %1118 = shalt.err (!%p1115_p10)
}
  0x24   : > { %s1292_s22 = smov 128   ;;  %s1293_s23 = smov 8  }
  0x25   : > { %s1577_s1 = sld [smem:[#allocation17_spill]]  ;;  %s1130_s14 = scalar_lea.vmem %s251_s18, 512 }
  0x26   : > { %p1131_p6 = scmp.ne.s32.totalorder %s251_s18, %s1130_s14  ;;  %p1138_p1 = scmp.lt.s32.totalorder %s251_s18, %s251_s18 }
  0x27   : > { %p1139_p4 = scmp.lt.s32.totalorder %s1130_s14, %s1130_s14 }
  0x28   : > { %p1133_p13 = pnand %p1131_p6, %p1095_p12 }
  0x29   : > { %p1140_p5 = por %p1139_p4, %p1138_p1 }
  0x2a   : > { %p1134_p0 = pneg %p1133_p13 }
  0x2b   : > { %1011 = dma.hbm_to_vmem [thread:$0]  (!%p1401_p11), %s1577_s1, 512, %s235_s15, [#allocation8], %s1292_s22, %s1292_s22, %s1293_s23  }
  0x2c   : > { %p1141_p3 = pnand %p1140_p5, %p1134_p0 }
  0x2e   : > { %1144 = shalt.err (!%p1141_p3)
}
  0x2f   : > { %s1578_s3 = sld [smem:[#allocation18_spill]]  ;;  %s1156_s15 = scalar_lea.vmem %s267_s20, 512 }
  0x30   : > { %p1157_p10 = scmp.ne.s32.totalorder %s267_s20, %s1156_s15  ;;  %p1164_p9 = scmp.lt.s32.totalorder %s267_s20, %s267_s20 }
  0x31   : > { %p1165_p13 = scmp.lt.s32.totalorder %s1156_s15, %s1156_s15 }
  0x32   : > { %p1159_p7 = pnand %p1157_p10, %p1095_p12 }
  0x33   : > { %p1166_p8 = por %p1165_p13, %p1164_p9 }
  0x34   : > { %p1160_p6 = pneg %p1159_p7 }
  0x35   : > { %1014 = dma.hbm_to_vmem [thread:$0]  (!%p1401_p11), %s1578_s3, 512, %s251_s18, [#allocation8], %s1292_s22, %s1292_s22, %s1293_s23  }
  0x36   : > { %p1167_p1 = pnand %p1166_p8, %p1160_p6 }
  0x38   : > { %1170 = shalt.err (!%p1167_p1)
}
  0x39   : > { %s1579_s5 = sld [smem:[#allocation19_spill]]  ;;  %s44_s18 = sadd.s32 1, %s1275_s26 }
  0x3a   : > { %s37_s8 = sadd.s32 1, %s1283_s28  ;;  %p51_p4 = scmp.ne.s32.totalorder %s1275_s26, %s1271_s25 }
  0x3b   : > { %p39_p8 = scmp.ge.s32.totalorder %s37_s8, 2  ;;  %p52_p12 = scmp.eq.s32.totalorder %s1287_s29, 0 }
  0x3c   : > { %p1438_p0 = por %p1376_p2, %p51_p4  ;;  %p1029_p5 = scmp.lt.s32.totalorder %s1287_s29, 2 }
  0x3d   : > { %s1593_s8 = smov (%p39_p8, %s37_s8), 0  ;;  %p53_p3 = por %p52_p12, %p51_p4 }
  0x3e   : > { %s283_s14 = sand.u32 1, %s1275_s26   ;;  %s41_s17 = ssub.s32 %s1283_s28, %s1593_s8 }
  0x3f   : > { %1017 = dma.hbm_to_vmem [thread:$0]  (!%p1401_p11), %s1579_s5, 512, %s267_s20, [#allocation11], %s1292_s22, %s1292_s22, %s1293_s23  }
  0x40   : > { %p42_p10 = scmp.eq.s32.totalorder %s41_s17, 0  ;;  %s909_s20 = sshll.u32 %s283_s14, 3 }
  0x41   : > { %s910_s22 = sshll.u32 %s1283_s28, 7  ;;  %s287_s21 = scalar_lea.vmem [#allocation4], %s909_s20 }
  0x42   : > { %s1450_s23 = scalar_select %p42_p10, %s1275_s26, %s44_s18  }
  0x43   : > { %s292_s10 = scalar_lea.hbm %s1556_s0, %s910_s22  ;;  %s294_s30 = sshll.u32 %s287_s21, 4  ;;  %s295_s30 = int_to_ptr.vmem [resolvable:$true] %s294_s30 }
  0x44   : > { %p1457_p2 = pnand %p1029_p5, %p53_p3  ;;  %s284_s3 = scalar_lea.sflag [#allocation5], %s283_s14 }
  0x45   : > { %s1184_s17 = scalar_lea.vmem %s295_s30, 128  ;;  %s1294_s18 = smov [#allocation4]  }
  0x46   : > { %p1173_p11 = pneg %p1457_p2  ;;  %p1185_p7 = scmp.ne.s32.totalorder %s295_s30, %s1184_s17 }
  0x47   : > { %s1189_s5 = sshll.u32 %s1294_s18, 4  ;;  %s1190_s5 = int_to_ptr.vmem [resolvable:$false] %s1189_s5 }
  0x48   : > { %p1187_p6 = pnand %p1185_p7, %p1173_p11  ;;  %s1191_s22 = scalar_lea.vmem %s1190_s5, 256 }
  0x49   : > { %p1192_p13 = scmp.lt.s32.totalorder %s295_s30, %s1190_s5  ;;  %p1193_p1 = scmp.lt.s32.totalorder %s1191_s22, %s1184_s17 }
  0x4a   : > { %p1188_p9 = pneg %p1187_p6 }
  0x4b   : > { %p1194_p4 = por %p1193_p1, %p1192_p13 }
  0x4d   : > { %p1195_p8 = pnand %p1194_p4, %p1188_p9 }
  0x4f   : > { %1198 = shalt.err (!%p1195_p8)
}
  0x50   : > { %1021 = dma.hbm_to_vmem [thread:$0]  (!%p1457_p2), %s292_s10, 128, %s295_s30, %s284_s3  }
  0x51   : > { %p1582_p12 = scmp.ne.s32.totalorder %s1575_s13, 0 }
  0x52   : > { %s1468_s14 = sand.u32 (!%p1582_p12), 1, %s1271_s25   ;;  %p1583_p5 = scmp.ne.s32.totalorder (!%p1582_p12), %s1573_s11, 0 }
  0x53   : > { %303 = sbr.rel (%p1582_p12) target bundleno = 868 (0x364), region = 48  ;;  %s912_s20 = sshll.u32 (!%p1582_p12), %s1468_s14, 3 }
  0x54   : > { %s306_s19 = scalar_lea.sflag (!%p1582_p12), [#allocation5], %s1468_s14  ;;  %s309_s5 = scalar_lea.vmem (!%p1582_p12), [#allocation4], %s912_s20 }
  0x58   : > { %1250 = dma.done.wait (%p1583_p5), %s306_s19, 128  }
  0x59   : > { %1252 = vsyncadd (%p1583_p5), %s306_s19, 4294967168  ;;  %p1584_p3 = scmp.ne.s32.totalorder %s1571_s9, 0 }
  0x5b   : > { %1254 = dma.done.wait (%p1584_p3), [#allocation8], 1024  }
  0x5c   : > { %1256 = vsyncadd (%p1584_p3), [#allocation8], 4294966272 }
  0x5d   : > { %1258 = dma.done.wait (%p1584_p3), [#allocation11], 512  }
  0x5e   : > { %1260 = vsyncadd (%p1584_p3), [#allocation11], 4294966784  ;;  %v1295_v0 = vmov 0.0   ;;  %vm1296_vm0 = vmmov 0   ;;  %v360_v1 = vld [vmem:[#allocation9 + $0x18] sm:$0xff]  ;;  %v359_v2 = vld [vmem:[#allocation9 + $0x10] sm:$0xff] }
  0x5f   : > { %949 = vmatprep.subr.mxu0 %v1295_v0  ;;  %957 = vmatprep.mubr.msk.f32.mxu0 %vm1296_vm0, %v1295_v0  ;;  %v358_v3 = vld [vmem:[#allocation9 + $0x8] sm:$0xff]  ;;  %v357_v4 = vld [vmem:[#allocation9] sm:$0xff]  ;;  %v356_v5 = vld [vmem:[%s309_s5] sm:$0xff]  ;;  %vm368_vm1 = vcmask 261120   ;;  %vm690_vm2 = vcmask 64512   ;;  %s927_s10 = sshll.u32 %s1279_s27, 7 }
  0x60   : > { %960 = vmatprep.subr.mxu1 %v1295_v0  ;;  %968 = vmatprep.mubr.msk.f32.mxu1 %vm1296_vm0, %v1295_v0  ;;  %v531_v6 = vld [vmem:[#allocation7 + $0x18] sm:$0xff]  ;;  %v530_v7 = vld [vmem:[#allocation7 + $0x10] sm:$0xff]  ;;  %v529_v8 = vld [vmem:[#allocation7 + $0x8] sm:$0xff]  ;;  %s351_s21 = scalar_lea.vmem [#allocation12], %s912_s20  ;;  %s1513_s22 = scalar_lea.hbm %s1563_s7, %s927_s10 }
  0x61   : > { %950 = vmatpush3.msra.mxu0 %v360_v1  ;;  %v528_v9 = vld [vmem:[#allocation7] sm:$0xff]  ;;  %v445_v10 = vld [vmem:[#allocation10 + $0x18] sm:$0xff]  ;;  %v444_v11 = vld [vmem:[#allocation10 + $0x10] sm:$0xff]  ;;  %s792_s30 = sshll.u32 %s351_s21, 4  ;;  %s778_s19 = scalar_lea.sflag [#allocation6], %s1468_s14  ;;  %s793_s30 = int_to_ptr.vmem [resolvable:$true] %s792_s30 }
  0x62   : > { %951 = vmatprep.subr.mxu0 %v1295_v0  ;;  %961 = vmatpush3.msra.mxu1 %v445_v10  ;;  %v443_v12 = vld [vmem:[#allocation10 + $0x8] sm:$0xff]  ;;  %v442_v13 = vld [vmem:[#allocation10] sm:$0xff]  ;;  %s1199_s5 = scalar_lea.vmem %s793_s30, 128  ;;  %s1297_s27 = smov [#allocation12]  }
  0x63   : > { %952 = vmatpush3.msra.mxu0 %v359_v2  ;;  %962 = vmatprep.subr.mxu1 %v1295_v0  ;;  %v917_v14 = vld [vmem:[%s1560_s4] ss:$0 sm:$0xff]  ;;  %p1200_p10 = scmp.ne.s32.totalorder %s793_s30, %s1199_s5  ;;  %s1203_s20 = sshll.u32 %s1297_s27, 4  ;;  %s1204_s20 = int_to_ptr.vmem [resolvable:$false] %s1203_s20 }
  0x64   : > { %953 = vmatprep.subr.mxu0 %v1295_v0  ;;  %963 = vmatpush3.msra.mxu1 %v444_v11  ;;  %v921_v18 = vld [vmem:[%s1558_s2] ss:$0 sm:$0xff]  ;;  %s1205_s1 = scalar_lea.vmem %s1204_s20, 256  ;;  %p1206_p7 = scmp.lt.s32.totalorder %s793_s30, %s1204_s20 }
  0x65   : > { %954 = vmatpush3.msra.mxu0 %v358_v3  ;;  %964 = vmatprep.subr.mxu1 %v1295_v0  ;;  %v919_v23 = vld [vmem:[%s1562_s6] ss:$0 sm:$0xff]  ;;  %p1201_p2 = pnand %p1200_p10, %p1438_p0  ;;  %p1207_p6 = scmp.lt.s32.totalorder %s1205_s1, %s1199_s5 }
  0x66   : > { %955 = vmatprep.subr.mxu0 %v1295_v0  ;;  %965 = vmatpush3.msra.mxu1 %v443_v12 }
  0x67   : > { %956 = vmatpush3.msra.mxu0 %v357_v4  ;;  %966 = vmatprep.subr.mxu1 %v1295_v0  ;;  %p1202_p11 = pneg %p1201_p2  ;;  %p1208_p9 = por %p1207_p6, %p1206_p7 }
  0x68   : > { %958 = vmatmul.mubr.msk.f32.vlgmr.msra.gmra.mxu0 %vm368_vm1, %v356_v5  ;;  %971 = vmatprep.subr.mxu0 %v1295_v0 }
  0x69   : > { %972 = vmatpush3.msra.mxu0 %v531_v6  ;;  %979 = vmatprep.mubr.msk.f32.mxu0 %vm1296_vm0, %v1295_v0  ;;  %p1209_p13 = pnand %p1208_p9, %p1202_p11 }
  0x6a   : > { %973 = vmatprep.subr.mxu0 %v1295_v0  ;;  %967 = vmatpush3.msra.mxu1 %v442_v13 }
  0x6b   : > { %974 = vmatpush3.msra.mxu0 %v530_v7  ;;  %969 = vmatmul.mubr.msk.f32.vlgmr.msra.gmra.mxu1 %vm368_vm1, %v356_v5 }
  0x6c   : > { %975 = vmatprep.subr.mxu0 %v1295_v0  ;;  %982 = vmatprep.subr.mxu1 %v1295_v0 }
  0x6d   : > { %976 = vmatpush3.msra.mxu0 %v529_v8  ;;  %984 = vmatprep.mubr.msk.f32.mxu1 %vm1296_vm0, %v1295_v0 }
  0x6e   : > { %977 = vmatprep.subr.mxu0 %v1295_v0 }
  0x6f   : > { %978 = vmatpush3.msra.mxu0 %v528_v9 }
  0x70   : > { %980 = vmatmul.mubr.msk.f32.vlgmr.msra.gmra.mxu0 %vm368_vm1, %v356_v5 }
 0x128   : > { %v438_v15 = vpop.f32.mrf.mxu0 }
 0x129   : > { %v439_v16 = vadd.f32 %v917_v14, %v438_v15 }
 0x12a   : > { %v959_v17 = vpop.f32.mrf.mxu0 }
 0x12b   : > { %523 = vst.msk [vmem:[#allocation2] sm:$0xff] %vm368_vm1, %v439_v16  ;;  %v519_v24 = vpop.f32.mrf.mxu1 }
 0x12c   : > { %v520_v25 = vadd.f32 %v919_v23, %v519_v24 }
 0x12d   : > { %v970_v26 = vpop.f32.mrf.mxu1 }
 0x12e   : > { %524 = vst.msk [vmem:[#allocation3] sm:$0xff] %vm368_vm1, %v520_v25 }
 0x130   : > { %v609_v19 = vpop.f32.mrf.mxu0 }
 0x131   : > { %v610_v20 = vadd.f32 %v921_v18, %v609_v19 }
 0x132   : > { %v613_v21 = vld [vmem:[#allocation2] sm:$0xff]  ;;  %v981_v22 = vpop.f32.mrf.mxu0 }
 0x133   : > { %983 = vmatpush3.xpose.msk.msra.mxu1 %vm368_vm1, %v613_v21 }
 0x134   : > { %987 = vmatprep.subr.mxu1 %v1295_v0 }
 0x135   : > { %v700_v27 = vld [vmem:[#allocation3] sm:$0xff] }
 0x136   : > { %985 = vmatmul.mubr.msk.f32.vlgmr.msra.gmra.mxu1 %vm368_vm1, %v610_v20 }
 0x137   : > { %989 = vmatprep.mubr.msk.f32.mxu1 %vm1296_vm0, %v1295_v0  ;;  %988 = vmatpush3.msra.mxu1 %v700_v27 }
 0x1f6   : > { %v686_v28 = vpop.f32.mrf.mxu1 }
 0x1f7   : > { %v691_v29 = vsel %vm690_vm2, %v686_v28, -inf }
 0x1f8   : > { %692 = vmax.xlane.f32.xlu0 %v691_v29  ;;  %v986_v30 = vpop.f32.mrf.mxu1 }
 0x281   : > { %v693_v31 = vpop.xlane.xlu0 %692 }
 0x282   : > { %v694_v32 = vsub.f32 %v686_v28, %v693_v31 }
 0x284   : > { %v695_v33 = vmul.f32 1.442695, %v694_v32 }
 0x286   : > { %1089 = vpow2.f32 %v695_v33 }
 0x293   : > { %v1090_v34 = vpop.eup %1089 }
 0x294   : > { %990 = vmatmul.mubr.msk.f32.vlgmr.msra.gmra.mxu1 %vm690_vm2, %v1090_v34  ;;  %v697_v35 = vsel %vm690_vm2, %v1090_v34, 0.0 }
 0x295   : > { %698 = vadd.xlane.f32.xlu0 %v697_v35 }
 0x31e   : > { %v699_v36 = vpop.xlane.xlu0 %698 }
 0x31f   : > { %1091 = vrcp.f32 %v699_v36 }
 0x32c   : > { %v1092_v37 = vpop.eup %1091 }
 0x354   : > { %v770_v38 = vpop.f32.mrf.mxu1 }
 0x355   : > { %v775_v39 = vmul.f32 %v1092_v37, %v770_v38 }
 0x356   : > { %v991_v40 = vpop.f32.mrf.mxu1 }
 0x357   : > { %776 = vst.msk [vmem:[%s351_s21] sm:$0xff] %vm368_vm1, %v775_v39 }
 0x358   : > { %1212 = shalt.err (!%p1209_p13)
}
 0x359   : > { %s1213_s3 = scalar_lea.hbm %s1513_s22, 128  ;;  %s1217_s11 = scalar_lea.hbm %s1563_s7, 256 }
 0x35a   : > { %p1214_p1 = scmp.ne.s32.totalorder %s1513_s22, %s1213_s3  ;;  %p1218_p12 = scmp.lt.s32.totalorder %s1513_s22, %s1563_s7 }
 0x35b   : > { %p1219_p5 = scmp.lt.s32.totalorder %s1217_s11, %s1213_s3 }
 0x35c   : > { %p1215_p4 = pnand %p1214_p1, %p1438_p0 }
 0x35d   : > { %p1220_p3 = por %p1219_p5, %p1218_p12 }
 0x35e   : > { %p1216_p8 = pneg %p1215_p4 }
 0x360   : > { %p1221_p10 = pnand %p1220_p3, %p1216_p8 }
 0x362   : > { %1224 = shalt.err (!%p1221_p10)
}
 0x363   : > { %1006 = dma.vmem_to_hbm [thread:$0]  (%p1438_p0), %s793_s30, 128, %s1513_s22, %s778_s19  }
 0x364 PF: > { %s804_s10 = sand.u32 1, %s1267_s24   ;;  %p1585_p2 = scmp.ne.s32.totalorder %s1574_s12, 0 }
 0x365   : > { %p1586_p11 = scmp.ge.s32.totalorder %s1287_s29, 2  ;;  %s805_s21 = scalar_lea.sflag [#allocation6], %s804_s10 }
 0x367   : > { %p1023_p7 = pnand %p1586_p11, %p1585_p2 }
 0x369   : > { %p1024_p6 = pneg %p1023_p7 }
 0x36b   : > { %1262 = dma.done.wait (%p1024_p6), %s805_s21, 128  }
 0x36c   : > { %1264 = vsyncadd (%p1024_p6), %s805_s21, 4294967168  ;;  %s25_s29 = sadd.s32 1, %s1287_s29   ;;  %s1587_s24 = smov %s1271_s25 }
 0x36d   : > { %p22_p9 = scmp.ge.s32.totalorder %s25_s29, 4   ;;  %s1588_s25 = smov %s1275_s26 }
 0x36e   : > { %s1589_s26 = smov %s1450_s23  ;;  %s1590_s27 = smov %s1283_s28 }
 0x36f   : > { %s1591_s28 = smov %s1593_s8  ;;  %24 = sbr.rel (!%p22_p9) target bundleno = 12 (0xc), region = 110 }
 0x374   :  { %810 = vsyncpa [#allocation5], 1 }
 0x375   :  { %812 = vsyncpa [#allocation5 + $0x1], 1 }
 0x376   :  { %813 = vsyncpa [#allocation8], 1 }
 0x377   :  { %814 = vsyncpa [#allocation11], 1 }
 0x378   :  { %815 = vsyncpa [#allocation6], 1 }
 0x379   :  { %817 = vsyncpa [#allocation6 + $0x1], 1 }

// kernel: tpu_custom_call.1
= control target key start
LH: loop header
LB: loop body
LE: loop exit
PB: predicated region body
PF: predicated region fallthrough
CT: control target
= control target key end

     0   :  { %s1556_s0 = inlined_call_operand.hbm [shape: f32[2,8,32], index: 0, kind: input, shape index: {}]   ;;  %s1557_s1 = inlined_call_operand.hbm [shape: f32[32,32], index: 1, kind: input, shape index: {}]   ;;  %s1558_s2 = inlined_call_operand.vmem [shape: f32[1,32], index: 2, kind: input, shape index: {}]   ;;  %s1559_s3 = inlined_call_operand.hbm [shape: f32[32,32], index: 3, kind: input, shape index: {}]   ;;  %s1560_s4 = inlined_call_operand.vmem [shape: f32[1,32], index: 4, kind: input, shape index: {}]   ;;  %s1561_s5 = inlined_call_operand.hbm [shape: f32[32,32], index: 5, kind: input, shape index: {}]   ;;  %s1562_s6 = inlined_call_operand.vmem [shape: f32[1,32], index: 6, kind: input, shape index: {}]   ;;  %s1563_s7 = inlined_call_operand.hbm [shape: f32[2,8,32], index: 7, kind: output, shape index: {}]  }
   0x1   :  { %1568 = sst [smem:[#allocation17_spill]] %s1557_s1 }
   0x2   :  { %1569 = sst [smem:[#allocation18_spill]] %s1559_s3 }
   0x3   :  { %1570 = sst [smem:[#allocation19_spill]] %s1561_s5 }
   0x4   :  { %12 = vsyncpa [#allocation5], 0 }
   0x5   :  { %14 = vsyncpa [#allocation5 + $0x1], 0 }
   0x6   :  { %15 = vsyncpa [#allocation8], 0 }
   0x7   :  { %16 = vsyncpa [#allocation11], 0 }
   0x8   :  { %17 = vsyncpa [#allocation6], 0 }
   0x9   :  { %19 = vsyncpa [#allocation6 + $0x1], 0  ;;  %s1338_s24 = smov 0   ;;  %s1340_s25 = smov 0  }
   0xa   :  { %s1342_s26 = smov 0   ;;  %s1344_s27 = smov 0  }
   0xb   :  { %s1346_s28 = smov 0   ;;  %s1348_s29 = smov 0  }
   0xc LB: > { %s902_s30 = sadd.s32 4294967295, %s1287_s29   ;;  %s903_s8 = sadd.s32 4294967294, %s1287_s29   ;;  %s1287_s29 = sphi %s1348_s29, %s25_s29   ;;  %s1283_s28 = sphi %s1346_s28, %s1591_s28   ;;  %s1279_s27 = sphi %s1344_s27, %s1590_s27   ;;  %s1275_s26 = sphi %s1342_s26, %s1589_s26   ;;  %s1271_s25 = sphi %s1340_s25, %s1588_s25   ;;  %s1267_s24 = sphi %s1338_s24, %s1587_s24  }
   0xd   : > { %p57_p0 = scmp.ne.s32.totalorder %s1271_s25, %s1267_s24  ;;  %p1372_p1 = scmp.eq.s32.totalorder %s902_s30, 0 }
   0xe   : > { %p1376_p2 = scmp.eq.s32.totalorder %s902_s30, 1  ;;  %p215_p3 = scmp.eq.s32.totalorder %s903_s8, 1 }
   0xf   : > { %s1571_s9 = scalar_select %p1372_p1, 1, 0 }
  0x10   : > { %p1382_p4 = por %p1372_p1, %p57_p0  ;;  %p904_p5 = scmp.ge.s32.totalorder %s1287_s29, 1 }
  0x11   : > { %p1387_p6 = por %p215_p3, %p57_p0  ;;  %p222_p7 = scmp.lt.s32.totalorder %s1287_s29, 3 }
  0x12   : > { %s1573_s11 = scalar_select %p1382_p4, 1, 0 }
  0x13   : > { %s1574_s12 = scalar_select %p1387_p6, 1, 0 }
  0x14   : > { %p1392_p8 = pnand %p904_p5, %p222_p7  ;;  %s1289_s14 = smov [#allocation7]  }
  0x15   : > { %s234_s15 = sshll.u32 %s1289_s14, 4  ;;  %s1290_s17 = smov [#allocation9]   ;;  %s235_s15 = int_to_ptr.vmem [resolvable:$true] %s234_s15 }
  0x16   : > { %s1575_s13 = scalar_select %p1392_p8, 1, 0 }
  0x17   : > { %p1008_p9 = pneg %p1392_p8  ;;  %s250_s18 = sshll.u32 %s1290_s17, 4  ;;  %s251_s18 = int_to_ptr.vmem [resolvable:$true] %s250_s18 }
  0x18   : > { %s1291_s19 = smov [#allocation10]   ;;  %s1104_s21 = scalar_lea.vmem %s235_s15, 512 }
  0x19   : > { %p1401_p11 = pnand %p1008_p9, %p1372_p1  ;;  %s266_s20 = sshll.u32 %s1291_s19, 4  ;;  %s267_s20 = int_to_ptr.vmem [resolvable:$true] %s266_s20 }
  0x1a   : > { %p1105_p13 = scmp.ne.s32.totalorder %s235_s15, %s1104_s21  ;;  %p1112_p5 = scmp.lt.s32.totalorder %s235_s15, %s235_s15 }
  0x1b   : > { %p1095_p12 = pneg %p1401_p11  ;;  %p1113_p7 = scmp.lt.s32.totalorder %s1104_s21, %s1104_s21 }
  0x1d   : > { %p1107_p0 = pnand %p1105_p13, %p1095_p12  ;;  %p1114_p9 = por %p1113_p7, %p1112_p5 }
  0x1f   : > { %p1108_p3 = pneg %p1107_p0 }
  0x21   : > { %p1115_p10 = pnand %p1114_p9, %p1108_p3 }
  0x23   : > { %1118 = shalt.err (!%p1115_p10)
}
  0x24   : > { %s1292_s22 = smov 128   ;;  %s1293_s23 = smov 8  }
  0x25   : > { %s1577_s1 = sld [smem:[#allocation17_spill]]  ;;  %s1130_s14 = scalar_lea.vmem %s251_s18, 512 }
  0x26   : > { %p1131_p6 = scmp.ne.s32.totalorder %s251_s18, %s1130_s14  ;;  %p1138_p1 = scmp.lt.s32.totalorder %s251_s18, %s251_s18 }
  0x27   : > { %p1139_p4 = scmp.lt.s32.totalorder %s1130_s14, %s1130_s14 }
  0x28   : > { %p1133_p13 = pnand %p1131_p6, %p1095_p12 }
  0x29   : > { %p1140_p5 = por %p1139_p4, %p1138_p1 }
  0x2a   : > { %p1134_p0 = pneg %p1133_p13 }
  0x2b   : > { %1011 = dma.hbm_to_vmem [thread:$0]  (!%p1401_p11), %s1577_s1, 512, %s235_s15, [#allocation8], %s1292_s22, %s1292_s22, %s1293_s23  }
  0x2c   : > { %p1141_p3 = pnand %p1140_p5, %p1134_p0 }
  0x2e   : > { %1144 = shalt.err (!%p1141_p3)
}
  0x2f   : > { %s1578_s3 = sld [smem:[#allocation18_spill]]  ;;  %s1156_s15 = scalar_lea.vmem %s267_s20, 512 }
  0x30   : > { %p1157_p10 = scmp.ne.s32.totalorder %s267_s20, %s1156_s15  ;;  %p1164_p9 = scmp.lt.s32.totalorder %s267_s20, %s267_s20 }
  0x31   : > { %p1165_p13 = scmp.lt.s32.totalorder %s1156_s15, %s1156_s15 }
  0x32   : > { %p1159_p7 = pnand %p1157_p10, %p1095_p12 }
  0x33   : > { %p1166_p8 = por %p1165_p13, %p1164_p9 }
  0x34   : > { %p1160_p6 = pneg %p1159_p7 }
  0x35   : > { %1014 = dma.hbm_to_vmem [thread:$0]  (!%p1401_p11), %s1578_s3, 512, %s251_s18, [#allocation8], %s1292_s22, %s1292_s22, %s1293_s23  }
  0x36   : > { %p1167_p1 = pnand %p1166_p8, %p1160_p6 }
  0x38   : > { %1170 = shalt.err (!%p1167_p1)
}
  0x39   : > { %s1579_s5 = sld [smem:[#allocation19_spill]]  ;;  %s44_s18 = sadd.s32 1, %s1275_s26 }
  0x3a   : > { %s37_s8 = sadd.s32 1, %s1283_s28  ;;  %p51_p4 = scmp.ne.s32.totalorder %s1275_s26, %s1271_s25 }
  0x3b   : > { %p39_p8 = scmp.ge.s32.totalorder %s37_s8, 2  ;;  %p52_p12 = scmp.eq.s32.totalorder %s1287_s29, 0 }
  0x3c   : > { %p1438_p0 = por %p1376_p2, %p51_p4  ;;  %p1029_p5 = scmp.lt.s32.totalorder %s1287_s29, 2 }
  0x3d   : > { %s1593_s8 = smov (%p39_p8, %s37_s8), 0  ;;  %p53_p3 = por %p52_p12, %p51_p4 }
  0x3e   : > { %s283_s14 = sand.u32 1, %s1275_s26   ;;  %s41_s17 = ssub.s32 %s1283_s28, %s1593_s8 }
  0x3f   : > { %1017 = dma.hbm_to_vmem [thread:$0]  (!%p1401_p11), %s1579_s5, 512, %s267_s20, [#allocation11], %s1292_s22, %s1292_s22, %s1293_s23  }
  0x40   : > { %p42_p10 = scmp.eq.s32.totalorder %s41_s17, 0  ;;  %s909_s20 = sshll.u32 %s283_s14, 3 }
  0x41   : > { %s910_s22 = sshll.u32 %s1283_s28, 7  ;;  %s287_s21 = scalar_lea.vmem [#allocation4], %s909_s20 }
  0x42   : > { %s1450_s23 = scalar_select %p42_p10, %s1275_s26, %s44_s18  }
  0x43   : > { %s292_s10 = scalar_lea.hbm %s1556_s0, %s910_s22  ;;  %s294_s30 = sshll.u32 %s287_s21, 4  ;;  %s295_s30 = int_to_ptr.vmem [resolvable:$true] %s294_s30 }
  0x44   : > { %p1457_p2 = pnand %p1029_p5, %p53_p3  ;;  %s284_s3 = scalar_lea.sflag [#allocation5], %s283_s14 }
  0x45   : > { %s1184_s17 = scalar_lea.vmem %s295_s30, 128  ;;  %s1294_s18 = smov [#allocation4]  }
  0x46   : > { %p1173_p11 = pneg %p1457_p2  ;;  %p1185_p7 = scmp.ne.s32.totalorder %s295_s30, %s1184_s17 }
  0x47   : > { %s1189_s5 = sshll.u32 %s1294_s18, 4  ;;  %s1190_s5 = int_to_ptr.vmem [resolvable:$false] %s1189_s5 }
  0x48   : > { %p1187_p6 = pnand %p1185_p7, %p1173_p11  ;;  %s1191_s22 = scalar_lea.vmem %s1190_s5, 256 }
  0x49   : > { %p1192_p13 = scmp.lt.s32.totalorder %s295_s30, %s1190_s5  ;;  %p1193_p1 = scmp.lt.s32.totalorder %s1191_s22, %s1184_s17 }
  0x4a   : > { %p1188_p9 = pneg %p1187_p6 }
  0x4b   : > { %p1194_p4 = por %p1193_p1, %p1192_p13 }
  0x4d   : > { %p1195_p8 = pnand %p1194_p4, %p1188_p9 }
  0x4f   : > { %1198 = shalt.err (!%p1195_p8)
}
  0x50   : > { %1021 = dma.hbm_to_vmem [thread:$0]  (!%p1457_p2), %s292_s10, 128, %s295_s30, %s284_s3  }
  0x51   : > { %p1582_p12 = scmp.ne.s32.totalorder %s1575_s13, 0 }
  0x52   : > { %s1468_s14 = sand.u32 (!%p1582_p12), 1, %s1271_s25   ;;  %p1583_p5 = scmp.ne.s32.totalorder (!%p1582_p12), %s1573_s11, 0 }
  0x53   : > { %303 = sbr.rel (%p1582_p12) target bundleno = 868 (0x364), region = 48  ;;  %s912_s20 = sshll.u32 (!%p1582_p12), %s1468_s14, 3 }
  0x54   : > { %s306_s19 = scalar_lea.sflag (!%p1582_p12), [#allocation5], %s1468_s14  ;;  %s309_s5 = scalar_lea.vmem (!%p1582_p12), [#allocation4], %s912_s20 }
  0x58   : > { %1250 = dma.done.wait (%p1583_p5), %s306_s19, 128  }
  0x59   : > { %1252 = vsyncadd (%p1583_p5), %s306_s19, 4294967168  ;;  %p1584_p3 = scmp.ne.s32.totalorder %s1571_s9, 0 }
  0x5b   : > { %1254 = dma.done.wait (%p1584_p3), [#allocation8], 1024  }
  0x5c   : > { %1256 = vsyncadd (%p1584_p3), [#allocation8], 4294966272 }
  0x5d   : > { %1258 = dma.done.wait (%p1584_p3), [#allocation11], 512  }
  0x5e   : > { %1260 = vsyncadd (%p1584_p3), [#allocation11], 4294966784  ;;  %v1295_v0 = vmov 0.0   ;;  %vm1296_vm0 = vmmov 0   ;;  %v360_v1 = vld [vmem:[#allocation9 + $0x18] sm:$0xff]  ;;  %v359_v2 = vld [vmem:[#allocation9 + $0x10] sm:$0xff] }
  0x5f   : > { %949 = vmatprep.subr.mxu0 %v1295_v0  ;;  %957 = vmatprep.mubr.msk.f32.mxu0 %vm1296_vm0, %v1295_v0  ;;  %v358_v3 = vld [vmem:[#allocation9 + $0x8] sm:$0xff]  ;;  %v357_v4 = vld [vmem:[#allocation9] sm:$0xff]  ;;  %v356_v5 = vld [vmem:[%s309_s5] sm:$0xff]  ;;  %vm368_vm1 = vcmask 261120   ;;  %vm690_vm2 = vcmask 64512   ;;  %s927_s10 = sshll.u32 %s1279_s27, 7 }
  0x60   : > { %960 = vmatprep.subr.mxu1 %v1295_v0  ;;  %968 = vmatprep.mubr.msk.f32.mxu1 %vm1296_vm0, %v1295_v0  ;;  %v531_v6 = vld [vmem:[#allocation7 + $0x18] sm:$0xff]  ;;  %v530_v7 = vld [vmem:[#allocation7 + $0x10] sm:$0xff]  ;;  %v529_v8 = vld [vmem:[#allocation7 + $0x8] sm:$0xff]  ;;  %s351_s21 = scalar_lea.vmem [#allocation12], %s912_s20  ;;  %s1513_s22 = scalar_lea.hbm %s1563_s7, %s927_s10 }
  0x61   : > { %950 = vmatpush3.msra.mxu0 %v360_v1  ;;  %v528_v9 = vld [vmem:[#allocation7] sm:$0xff]  ;;  %v445_v10 = vld [vmem:[#allocation10 + $0x18] sm:$0xff]  ;;  %v444_v11 = vld [vmem:[#allocation10 + $0x10] sm:$0xff]  ;;  %s792_s30 = sshll.u32 %s351_s21, 4  ;;  %s778_s19 = scalar_lea.sflag [#allocation6], %s1468_s14  ;;  %s793_s30 = int_to_ptr.vmem [resolvable:$true] %s792_s30 }
  0x62   : > { %951 = vmatprep.subr.mxu0 %v1295_v0  ;;  %961 = vmatpush3.msra.mxu1 %v445_v10  ;;  %v443_v12 = vld [vmem:[#allocation10 + $0x8] sm:$0xff]  ;;  %v442_v13 = vld [vmem:[#allocation10] sm:$0xff]  ;;  %s1199_s5 = scalar_lea.vmem %s793_s30, 128  ;;  %s1297_s27 = smov [#allocation12]  }
  0x63   : > { %952 = vmatpush3.msra.mxu0 %v359_v2  ;;  %962 = vmatprep.subr.mxu1 %v1295_v0  ;;  %v917_v14 = vld [vmem:[%s1560_s4] ss:$0 sm:$0xff]  ;;  %p1200_p10 = scmp.ne.s32.totalorder %s793_s30, %s1199_s5  ;;  %s1203_s20 = sshll.u32 %s1297_s27, 4  ;;  %s1204_s20 = int_to_ptr.vmem [resolvable:$false] %s1203_s20 }
  0x64   : > { %953 = vmatprep.subr.mxu0 %v1295_v0  ;;  %963 = vmatpush3.msra.mxu1 %v444_v11  ;;  %v921_v18 = vld [vmem:[%s1558_s2] ss:$0 sm:$0xff]  ;;  %s1205_s1 = scalar_lea.vmem %s1204_s20, 256  ;;  %p1206_p7 = scmp.lt.s32.totalorder %s793_s30, %s1204_s20 }
  0x65   : > { %954 = vmatpush3.msra.mxu0 %v358_v3  ;;  %964 = vmatprep.subr.mxu1 %v1295_v0  ;;  %v919_v23 = vld [vmem:[%s1562_s6] ss:$0 sm:$0xff]  ;;  %p1201_p2 = pnand %p1200_p10, %p1438_p0  ;;  %p1207_p6 = scmp.lt.s32.totalorder %s1205_s1, %s1199_s5 }
  0x66   : > { %955 = vmatprep.subr.mxu0 %v1295_v0  ;;  %965 = vmatpush3.msra.mxu1 %v443_v12 }
  0x67   : > { %956 = vmatpush3.msra.mxu0 %v357_v4  ;;  %966 = vmatprep.subr.mxu1 %v1295_v0  ;;  %p1202_p11 = pneg %p1201_p2  ;;  %p1208_p9 = por %p1207_p6, %p1206_p7 }
  0x68   : > { %958 = vmatmul.mubr.msk.f32.vlgmr.msra.gmra.mxu0 %vm368_vm1, %v356_v5  ;;  %971 = vmatprep.subr.mxu0 %v1295_v0 }
  0x69   : > { %972 = vmatpush3.msra.mxu0 %v531_v6  ;;  %979 = vmatprep.mubr.msk.f32.mxu0 %vm1296_vm0, %v1295_v0  ;;  %p1209_p13 = pnand %p1208_p9, %p1202_p11 }
  0x6a   : > { %973 = vmatprep.subr.mxu0 %v1295_v0  ;;  %967 = vmatpush3.msra.mxu1 %v442_v13 }
  0x6b   : > { %974 = vmatpush3.msra.mxu0 %v530_v7  ;;  %969 = vmatmul.mubr.msk.f32.vlgmr.msra.gmra.mxu1 %vm368_vm1, %v356_v5 }
  0x6c   : > { %975 = vmatprep.subr.mxu0 %v1295_v0  ;;  %982 = vmatprep.subr.mxu1 %v1295_v0 }
  0x6d   : > { %976 = vmatpush3.msra.mxu0 %v529_v8  ;;  %984 = vmatprep.mubr.msk.f32.mxu1 %vm1296_vm0, %v1295_v0 }
  0x6e   : > { %977 = vmatprep.subr.mxu0 %v1295_v0 }
  0x6f   : > { %978 = vmatpush3.msra.mxu0 %v528_v9 }
  0x70   : > { %980 = vmatmul.mubr.msk.f32.vlgmr.msra.gmra.mxu0 %vm368_vm1, %v356_v5 }
 0x128   : > { %v438_v15 = vpop.f32.mrf.mxu0 }
 0x129   : > { %v439_v16 = vadd.f32 %v917_v14, %v438_v15 }
 0x12a   : > { %v959_v17 = vpop.f32.mrf.mxu0 }
 0x12b   : > { %523 = vst.msk [vmem:[#allocation2] sm:$0xff] %vm368_vm1, %v439_v16  ;;  %v519_v24 = vpop.f32.mrf.mxu1 }
 0x12c   : > { %v520_v25 = vadd.f32 %v919_v23, %v519_v24 }
 0x12d   : > { %v970_v26 = vpop.f32.mrf.mxu1 }
 0x12e   : > { %524 = vst.msk [vmem:[#allocation3] sm:$0xff] %vm368_vm1, %v520_v25 }
 0x130   : > { %v609_v19 = vpop.f32.mrf.mxu0 }
 0x131   : > { %v610_v20 = vadd.f32 %v921_v18, %v609_v19 }
 0x132   : > { %v613_v21 = vld [vmem:[#allocation2] sm:$0xff]  ;;  %v981_v22 = vpop.f32.mrf.mxu0 }
 0x133   : > { %983 = vmatpush3.xpose.msk.msra.mxu1 %vm368_vm1, %v613_v21 }
 0x134   : > { %987 = vmatprep.subr.mxu1 %v1295_v0 }
 0x135   : > { %v700_v27 = vld [vmem:[#allocation3] sm:$0xff] }
 0x136   : > { %985 = vmatmul.mubr.msk.f32.vlgmr.msra.gmra.mxu1 %vm368_vm1, %v610_v20 }
 0x137   : > { %989 = vmatprep.mubr.msk.f32.mxu1 %vm1296_vm0, %v1295_v0  ;;  %988 = vmatpush3.msra.mxu1 %v700_v27 }
 0x1f6   : > { %v686_v28 = vpop.f32.mrf.mxu1 }
 0x1f7   : > { %v691_v29 = vsel %vm690_vm2, %v686_v28, -inf }
 0x1f8   : > { %692 = vmax.xlane.f32.xlu0 %v691_v29  ;;  %v986_v30 = vpop.f32.mrf.mxu1 }
 0x281   : > { %v693_v31 = vpop.xlane.xlu0 %692 }
 0x282   : > { %v694_v32 = vsub.f32 %v686_v28, %v693_v31 }
 0x284   : > { %v695_v33 = vmul.f32 1.442695, %v694_v32 }
 0x286   : > { %1089 = vpow2.f32 %v695_v33 }
 0x293   : > { %v1090_v34 = vpop.eup %1089 }
 0x294   : > { %990 = vmatmul.mubr.msk.f32.vlgmr.msra.gmra.mxu1 %vm690_vm2, %v1090_v34  ;;  %v697_v35 = vsel %vm690_vm2, %v1090_v34, 0.0 }
 0x295   : > { %698 = vadd.xlane.f32.xlu0 %v697_v35 }
 0x31e   : > { %v699_v36 = vpop.xlane.xlu0 %698 }
 0x31f   : > { %1091 = vrcp.f32 %v699_v36 }
 0x32c   : > { %v1092_v37 = vpop.eup %1091 }
 0x354   : > { %v770_v38 = vpop.f32.mrf.mxu1 }
 0x355   : > { %v775_v39 = vmul.f32 %v1092_v37, %v770_v38 }
 0x356   : > { %v991_v40 = vpop.f32.mrf.mxu1 }
 0x357   : > { %776 = vst.msk [vmem:[%s351_s21] sm:$0xff] %vm368_vm1, %v775_v39 }
 0x358   : > { %1212 = shalt.err (!%p1209_p13)
}
 0x359   : > { %s1213_s3 = scalar_lea.hbm %s1513_s22, 128  ;;  %s1217_s11 = scalar_lea.hbm %s1563_s7, 256 }
 0x35a   : > { %p1214_p1 = scmp.ne.s32.totalorder %s1513_s22, %s1213_s3  ;;  %p1218_p12 = scmp.lt.s32.totalorder %s1513_s22, %s1563_s7 }
 0x35b   : > { %p1219_p5 = scmp.lt.s32.totalorder %s1217_s11, %s1213_s3 }
 0x35c   : > { %p1215_p4 = pnand %p1214_p1, %p1438_p0 }
 0x35d   : > { %p1220_p3 = por %p1219_p5, %p1218_p12 }
 0x35e   : > { %p1216_p8 = pneg %p1215_p4 }
 0x360   : > { %p1221_p10 = pnand %p1220_p3, %p1216_p8 }
 0x362   : > { %1224 = shalt.err (!%p1221_p10)
}
 0x363   : > { %1006 = dma.vmem_to_hbm [thread:$0]  (%p1438_p0), %s793_s30, 128, %s1513_s22, %s778_s19  }
 0x364 PF: > { %s804_s10 = sand.u32 1, %s1267_s24   ;;  %p1585_p2 = scmp.ne.s32.totalorder %s1574_s12, 0 }
 0x365   : > { %p1586_p11 = scmp.ge.s32.totalorder %s1287_s29, 2  ;;  %s805_s21 = scalar_lea.sflag [#allocation6], %s804_s10 }
 0x367   : > { %p1023_p7 = pnand %p1586_p11, %p1585_p2 }
 0x369   : > { %p1024_p6 = pneg %p1023_p7 }
 0x36b   : > { %1262 = dma.done.wait (%p1024_p6), %s805_s21, 128  }
 0x36c   : > { %1264 = vsyncadd (%p1024_p6), %s805_s21, 4294967168  ;;  %s25_s29 = sadd.s32 1, %s1287_s29   ;;  %s1587_s24 = smov %s1271_s25 }
 0x36d   : > { %p22_p9 = scmp.ge.s32.totalorder %s25_s29, 4   ;;  %s1588_s25 = smov %s1275_s26 }
 0x36e   : > { %s1589_s26 = smov %s1450_s23  ;;  %s1590_s27 = smov %s1283_s28 }
 0x36f   : > { %s1591_s28 = smov %s1593_s8  ;;  %24 = sbr.rel (!%p22_p9) target bundleno = 12 (0xc), region = 110 }
 0x374   :  { %810 = vsyncpa [#allocation5], 1 }
 0x375   :  { %812 = vsyncpa [#allocation5 + $0x1], 1 }
 0x376   :  { %813 = vsyncpa [#allocation8], 1 }
 0x377   :  { %814 = vsyncpa [#allocation11], 1 }
 0x378   :  { %815 = vsyncpa [#allocation6], 1 }
 0x379   :  { %817 = vsyncpa [#allocation6 + $0x1], 1 }

</bundles_post_ra>
